<compile_context>
chip_gen: v7x
topology: tpu7x:2x2x1
jax: 0.10.0
libtpu: 0.0.40
codegen_flags: <defaults>
</compile_context>

<pallas_src>
import functools

import jax
import jax.numpy as jnp
from jax.experimental import pallas as pl
from jax.experimental.pallas import tpu as pltpu


# ------------------------------ helpers ------------------------------------ #

def _round_up(x, m):
    return (x + m - 1) // m * m


def _pick_row_tile(n, adj_budget_bytes=24 << 20):
    """Largest row tile TM (multiple of 8) whose double-buffered bf16 adjacency
    blocks (2 branches x 2 buffers x TM x N_pad x 2B) fit the budget."""
    n8 = _round_up(max(n, 8), 8)
    for tm in (512, 256, 128, 64, 32, 16, 8):
        if tm > n8:
            continue
        n_pad = _round_up(n, tm)
        if 8 * tm * n_pad <= adj_budget_bytes:
            return tm, n_pad
    return 8, _round_up(n, 8)


def _vmem_limit_bytes(tm, n_pad, f_in, f_pad):
    adj = 2 * 2 * tm * n_pad * 2                     # 2 adjacencies, double-buffered, bf16
    feats = 2 * 2 * n_pad * f_in * 2                 # s/t resident (2 buffers each), bf16
    weights = 2 * 2 * (2 * f_in * f_pad * 2 + f_pad * 4)
    out = 2 * tm * 2 * f_pad * 4
    need = adj + feats + weights + out + (4 << 20)   # slack for compiler scratch
    return int(min(max(need, 32 << 20), 56 << 20))   # safe on v5e/v6e/v7x


# ----------------------------- Pallas kernel ------------------------------- #

def _sage_layer_kernel(adj_f_ref, adj_r_ref, t_ref, s_ref,
                       wcat_s_ref, b_s_ref, wcat_t_ref, b_t_ref,
                       out_ref, *, tm, apply_relu):
    """One DirectedGNN layer (both branches) for one tile of TM output rows.

    adj_f_ref / adj_r_ref : (TM, N_pad) bf16   streamed row tiles of mean-norm adjacency
    t_ref / s_ref         : (N_pad, Fin) bf16  full feature matrices (VMEM resident)
    wcat_*_ref            : (2*Fin, F_pad) bf16  stacked [Wl.T ; Wr.T], zero-padded cols
    b_*_ref               : (1, F_pad) f32
    out_ref               : (TM, 2*F_pad)      lane-dense [s_branch | t_branch] slab
    """
    i = pl.program_id(0)
    row0 = pl.multiple_of(i * tm, tm)

    t_all = t_ref[...]
    s_all = s_ref[...]

    # ---- source branch: aggregates TARGET features over forward edges ----
    aggr_s = jnp.dot(adj_f_ref[...], t_all, preferred_element_type=jnp.float32)
    feat_s = jnp.concatenate(
        [aggr_s.astype(jnp.bfloat16), t_ref[pl.ds(row0, tm), :]], axis=-1)
    out_s = (jnp.dot(feat_s, wcat_s_ref[...], preferred_element_type=jnp.float32)
             + b_s_ref[...])

    # ---- target branch: aggregates SOURCE features over reversed edges ----
    aggr_t = jnp.dot(adj_r_ref[...], s_all, preferred_element_type=jnp.float32)
    feat_t = jnp.concatenate(
        [aggr_t.astype(jnp.bfloat16), s_ref[pl.ds(row0, tm), :]], axis=-1)
    out_t = (jnp.dot(feat_t, wcat_t_ref[...], preferred_element_type=jnp.float32)
             + b_t_ref[...])

    if apply_relu:
        out_s = jnp.maximum(out_s, 0.0)
        out_t = jnp.maximum(out_t, 0.0)
        # TODO(synk): dropout(p=0.5) is identity in eval mode; training not implemented.

    # Single lane-dense (TM, 2*F_pad) store.
    out_ref[...] = jnp.concatenate([out_s, out_t], axis=-1).astype(out_ref.dtype)


def _sage_layer_call(adj_f, adj_r, t_feat, s_feat, wcat_s, b_s, wcat_t, b_t,
                     *, tm, apply_relu, out_dtype):
    n_pad = adj_f.shape[0]
    f_in = t_feat.shape[1]
    f_pad = wcat_s.shape[1]
    grid = (n_pad // tm,)

    row_spec = pl.BlockSpec((tm, n_pad), lambda i: (i, 0))
    resident = lambda shape: pl.BlockSpec(shape, lambda i: (0, 0))

    kern = functools.partial(_sage_layer_kernel, tm=tm, apply_relu=apply_relu)
    return pl.pallas_call(
        kern,
        out_shape=jax.ShapeDtypeStruct((n_pad, 2 * f_pad), out_dtype),
        grid=grid,
        in_specs=[row_spec, row_spec,
                  resident((n_pad, f_in)), resident((n_pad, f_in)),
                  resident(wcat_s.shape), resident(b_s.shape),
                  resident(wcat_t.shape), resident(b_t.shape)],
        out_specs=pl.BlockSpec((tm, 2 * f_pad), lambda i: (i, 0)),
        compiler_params=pltpu.CompilerParams(
            dimension_semantics=("parallel",),
            vmem_limit_bytes=_vmem_limit_bytes(tm, n_pad, f_in, f_pad)),
    )(adj_f, adj_r, t_feat, s_feat, wcat_s, b_s, wcat_t, b_t)


# ------------------------------- JAX glue ----------------------------------- #

def build_mean_adjacency(edge_index, edge_weight_sig, num_nodes):
    """Dense normalized adjacency: A[i, j] = sum_{e: j->i} w_e / in_deg(i)."""
    src = edge_index[0]
    dst = edge_index[1]
    adj = jnp.zeros((num_nodes, num_nodes), jnp.float32)
    adj = adj.at[dst, src].add(edge_weight_sig)
    deg = jnp.zeros((num_nodes,), jnp.float32).at[dst].add(1.0)
    deg = jnp.maximum(deg, 1.0)  # isolated nodes -> zero aggregation (matches PyG mean)
    return adj / deg[:, None]


def _pack_wcat(wl, wr, f_pad):
    """Stacked [Wl.T ; Wr.T] with zero-padded output columns, bf16."""
    f_out = wl.shape[0]
    wcat = jnp.concatenate([wl.T, wr.T], axis=0)          # (2*Fin, Fout)
    wcat = jnp.pad(wcat, ((0, 0), (0, f_pad - f_out)))
    return wcat.astype(jnp.bfloat16)


@jax.jit
def directed_gnn_forward(params, s, t, edge_index, edge_weight):
    n = s.shape[0]
    ew = jax.nn.sigmoid(edge_weight.astype(jnp.float32))

    adj_f = build_mean_adjacency(edge_index, ew, n)
    adj_r = build_mean_adjacency(edge_index[::-1], ew, n)

    tm, n_pad = _pick_row_tile(n)
    pad_n = n_pad - n
    adj_f = jnp.pad(adj_f, ((0, pad_n), (0, pad_n))).astype(jnp.bfloat16)
    adj_r = jnp.pad(adj_r, ((0, pad_n), (0, pad_n))).astype(jnp.bfloat16)

    s_cur = jnp.pad(s, ((0, pad_n), (0, 0))).astype(jnp.bfloat16)
    t_cur = jnp.pad(t, ((0, pad_n), (0, 0))).astype(jnp.bfloat16)

    num_layers = len(params)
    for layer_id, branch in enumerate(params):
        wl_s, wr_s, b_s = branch["source"]
        wl_t, wr_t, b_t = branch["target"]
        f_out = wl_s.shape[0]
        f_pad = _round_up(max(f_out, 64), 64)   # per-branch padded width -> 128-lane slab

        wcat_s = _pack_wcat(wl_s, wr_s, f_pad)
        wcat_t = _pack_wcat(wl_t, wr_t, f_pad)
        bp_s = jnp.pad(b_s, (0, f_pad - f_out)).reshape(1, f_pad).astype(jnp.float32)
        bp_t = jnp.pad(b_t, (0, f_pad - f_out)).reshape(1, f_pad).astype(jnp.float32)

        is_last = layer_id == num_layers - 1
        out = _sage_layer_call(
            adj_f, adj_r, t_cur, s_cur, wcat_s, bp_s, wcat_t, bp_t,
            tm=tm, apply_relu=not is_last,
            out_dtype=jnp.float32 if is_last else jnp.bfloat16)

        if is_last:
            return out[:n, :f_out], out[:n, f_pad:f_pad + f_out]
        s_cur = out[:, :f_out]
        t_cur = out[:, f_pad:f_pad + f_out]


def reference_forward(params, s, t, edge_index, edge_weight):
    """Pure-JAX f32 reference (same math, no Pallas, no bf16)."""
    ew = jax.nn.sigmoid(edge_weight.astype(jnp.float32))
    a_f = build_mean_adjacency(edge_index, ew, s.shape[0])
    a_r = build_mean_adjacency(edge_index[::-1], ew, s.shape[0])
    num_layers = len(params)
    for layer_id, branch in enumerate(params):
        wl_s, wr_s, b_s = branch["source"]
        wl_t, wr_t, b_t = branch["target"]
        s_new = (a_f @ t) @ wl_s.T + t @ wr_s.T + b_s
        t_new = (a_r @ s) @ wl_t.T + s @ wr_t.T + b_t
        if layer_id < num_layers - 1:
            s_new = jax.nn.relu(s_new)
            t_new = jax.nn.relu(t_new)
        s, t = s_new, t_new
    return s, t


def init_params(key, layers):
    """Per layer, per branch (source/target): Wl (Fout, Fin), Wr (Fout, Fin), b (Fout)."""
    params = []
    for n_in, n_out in zip(layers[:-1], layers[1:]):
        branch = {}
        for name in ("source", "target"):
            key, k1, k2, k3 = jax.random.split(key, 4)
            scale = 1.0 / jnp.sqrt(jnp.float32(n_in))
            wl = jax.random.uniform(k1, (n_out, n_in), jnp.float32, -scale, scale)
            wr = jax.random.uniform(k2, (n_out, n_in), jnp.float32, -scale, scale)
            b = jax.random.uniform(k3, (n_out,), jnp.float32, -scale, scale)
            branch[name] = (wl, wr, b)
        params.append(branch)
    return params


# --------------------------------- main ------------------------------------- #

if __name__ == "__main__":
    in_channels, hidden_channels, out_channels = 16, 32, 8
    num_nodes, num_edges = 32, 64

    key = jax.random.PRNGKey(0)
    k_s, k_t, k_ei, k_ew, k_param = jax.random.split(key, 5)

    s = jax.random.normal(k_s, (num_nodes, in_channels), jnp.float32)
    t = jax.random.normal(k_t, (num_nodes, in_channels), jnp.float32)
    edge_index = jax.random.randint(k_ei, (2, num_edges), 0, num_nodes, jnp.int32)
    edge_weight = jax.random.normal(k_ew, (num_edges,), jnp.float32)

    params = init_params(k_param, [in_channels, hidden_channels, out_channels])

    s_out, t_out = directed_gnn_forward(params, s, t, edge_index, edge_weight)
    jax.block_until_ready((s_out, t_out))

    assert s_out.shape == (num_nodes, out_channels)
    assert t_out.shape == (num_nodes, out_channels)

    # Correctness check vs. f32 pure-JAX reference (loose tol: bf16 MXU path).
    s_ref, t_ref = reference_forward(params, s, t, edge_index, edge_weight)
    assert jnp.allclose(s_out, s_ref, rtol=1e-1, atol=1e-1)
    assert jnp.allclose(t_out, t_ref, rtol=1e-1, atol=1e-1)

    print("KERNEL_OK")
</pallas_src>

<mosaic_0001>
module attributes {stable_mosaic.version = 11 : i64} {
  func.func private @main(%arg0: i32) attributes {dimension_semantics = [#tpu.dimension_semantics<core_parallel>], iteration_bounds = array<i64: 2>, tpu.core_type = #tpu.core_type<sc_scalar_subcore>, window_params = []} {
    return
  }
}

module attributes {stable_mosaic.version = 11 : i64} {
  func.func private @main(%arg0: i32) attributes {dimension_semantics = [#tpu.dimension_semantics<core_parallel>], iteration_bounds = array<i64: 2>, tpu.core_type = #tpu.core_type<sc_scalar_subcore>, window_params = []} {
    return
  }
}

module attributes {stable_mosaic.version = 11 : i64} {
  func.func @_sage_layer_kernel(%arg0: i32, %arg1: memref<32x32xbf16, #tpu.memory_space<vmem>>, %arg2: memref<32x32xbf16, #tpu.memory_space<vmem>>, %arg3: memref<32x32xbf16, #tpu.memory_space<vmem>>, %arg4: memref<32x32xbf16, #tpu.memory_space<vmem>>, %arg5: memref<64x64xbf16, #tpu.memory_space<vmem>>, %arg6: memref<1x64xf32, #tpu.memory_space<vmem>>, %arg7: memref<64x64xbf16, #tpu.memory_space<vmem>>, %arg8: memref<1x64xf32, #tpu.memory_space<vmem>>, %arg9: memref<32x128xf32, #tpu.memory_space<vmem>>) attributes {dimension_semantics = [#tpu.dimension_semantics<parallel>], iteration_bounds = array<i64: 1>, scalar_prefetch = 0 : i64, scratch_operands = 0 : i64, tpu.core_type = #tpu.core_type<tc>, window_params = [{transform_indices = @transform_0, window_bounds = array<i64: 32, 32>}, {transform_indices = @transform_1, window_bounds = array<i64: 32, 32>}, {pipeline_mode = #tpu.pipeline_mode<synchronous>, transform_indices = @transform_2, window_bounds = array<i64: 32, 32>}, {pipeline_mode = #tpu.pipeline_mode<synchronous>, transform_indices = @transform_3, window_bounds = array<i64: 32, 32>}, {pipeline_mode = #tpu.pipeline_mode<synchronous>, transform_indices = @transform_4, window_bounds = array<i64: 64, 64>}, {pipeline_mode = #tpu.pipeline_mode<synchronous>, transform_indices = @transform_5, window_bounds = array<i64: 1, 64>}, {pipeline_mode = #tpu.pipeline_mode<synchronous>, transform_indices = @transform_6, window_bounds = array<i64: 64, 64>}, {pipeline_mode = #tpu.pipeline_mode<synchronous>, transform_indices = @transform_7, window_bounds = array<i64: 1, 64>}, {transform_indices = @transform_8, window_bounds = array<i64: 32, 128>}]} {
    %c32_i32 = arith.constant 32 : i32
    %0 = arith.muli %arg0, %c32_i32 : i32
    %1 = tpu.assume_multiple %0, 32 : i32
    %c0 = arith.constant 0 : index
    %c0_0 = arith.constant 0 : index
    %2 = vector.load %arg3[%c0, %c0_0] : memref<32x32xbf16, #tpu.memory_space<vmem>>, vector<32x32xbf16>
    %c0_1 = arith.constant 0 : index
    %c0_2 = arith.constant 0 : index
    %3 = vector.load %arg4[%c0_1, %c0_2] : memref<32x32xbf16, #tpu.memory_space<vmem>>, vector<32x32xbf16>
    %c0_3 = arith.constant 0 : index
    %c0_4 = arith.constant 0 : index
    %4 = vector.load %arg1[%c0_3, %c0_4] : memref<32x32xbf16, #tpu.memory_space<vmem>>, vector<32x32xbf16>
    %cst = arith.constant dense<0.000000e+00> : vector<32x32xf32>
    %5 = tpu.matmul %4, %2, %cst {dimension_numbers = #tpu.dot_dimension_numbers<[1], [0], [0], [1], [0, 0, 1, 1], [], []>} : vector<32x32xbf16>, vector<32x32xbf16>, vector<32x32xf32> -> vector<32x32xf32>
    %6 = arith.truncf %5 : vector<32x32xf32> to vector<32x32xbf16>
    %7 = arith.index_cast %1 : i32 to index
    %c0_5 = arith.constant 0 : index
    %8 = vector.load %arg3[%7, %c0_5] : memref<32x32xbf16, #tpu.memory_space<vmem>>, vector<32x32xbf16>
    %9 = tpu.concatenate %6, %8 in 1 : vector<32x32xbf16>, vector<32x32xbf16> -> vector<32x64xbf16>
    %c0_6 = arith.constant 0 : index
    %c0_7 = arith.constant 0 : index
    %10 = vector.load %arg5[%c0_6, %c0_7] : memref<64x64xbf16, #tpu.memory_space<vmem>>, vector<64x64xbf16>
    %cst_8 = arith.constant dense<0.000000e+00> : vector<32x64xf32>
    %11 = tpu.matmul %9, %10, %cst_8 {dimension_numbers = #tpu.dot_dimension_numbers<[1], [0], [0], [1], [0, 0, 1, 1], [], []>} : vector<32x64xbf16>, vector<64x64xbf16>, vector<32x64xf32> -> vector<32x64xf32>
    %c0_9 = arith.constant 0 : index
    %c0_10 = arith.constant 0 : index
    %12 = vector.load %arg6[%c0_9, %c0_10] : memref<1x64xf32, #tpu.memory_space<vmem>>, vector<1x64xf32>
    %13 = vector.broadcast %12 : vector<1x64xf32> to vector<32x64xf32>
    %14 = arith.addf %11, %13 : vector<32x64xf32>
    %c0_11 = arith.constant 0 : index
    %c0_12 = arith.constant 0 : index
    %15 = vector.load %arg2[%c0_11, %c0_12] : memref<32x32xbf16, #tpu.memory_space<vmem>>, vector<32x32xbf16>
    %cst_13 = arith.constant dense<0.000000e+00> : vector<32x32xf32>
    %16 = tpu.matmul %15, %3, %cst_13 {dimension_numbers = #tpu.dot_dimension_numbers<[1], [0], [0], [1], [0, 0, 1, 1], [], []>} : vector<32x32xbf16>, vector<32x32xbf16>, vector<32x32xf32> -> vector<32x32xf32>
    %17 = arith.truncf %16 : vector<32x32xf32> to vector<32x32xbf16>
    %18 = arith.index_cast %1 : i32 to index
    %c0_14 = arith.constant 0 : index
    %19 = vector.load %arg4[%18, %c0_14] : memref<32x32xbf16, #tpu.memory_space<vmem>>, vector<32x32xbf16>
    %20 = tpu.concatenate %17, %19 in 1 : vector<32x32xbf16>, vector<32x32xbf16> -> vector<32x64xbf16>
    %c0_15 = arith.constant 0 : index
    %c0_16 = arith.constant 0 : index
    %21 = vector.load %arg7[%c0_15, %c0_16] : memref<64x64xbf16, #tpu.memory_space<vmem>>, vector<64x64xbf16>
    %cst_17 = arith.constant dense<0.000000e+00> : vector<32x64xf32>
    %22 = tpu.matmul %20, %21, %cst_17 {dimension_numbers = #tpu.dot_dimension_numbers<[1], [0], [0], [1], [0, 0, 1, 1], [], []>} : vector<32x64xbf16>, vector<64x64xbf16>, vector<32x64xf32> -> vector<32x64xf32>
    %c0_18 = arith.constant 0 : index
    %c0_19 = arith.constant 0 : index
    %23 = vector.load %arg8[%c0_18, %c0_19] : memref<1x64xf32, #tpu.memory_space<vmem>>, vector<1x64xf32>
    %24 = vector.broadcast %23 : vector<1x64xf32> to vector<32x64xf32>
    %25 = arith.addf %22, %24 : vector<32x64xf32>
    %26 = tpu.concatenate %14, %25 in 1 : vector<32x64xf32>, vector<32x64xf32> -> vector<32x128xf32>
    %c0_20 = arith.constant 0 : index
    %c0_21 = arith.constant 0 : index
    %27 = vector.load %arg9[%c0_20, %c0_21] : memref<32x128xf32, #tpu.memory_space<vmem>>, vector<32x128xf32>
    tpu.vector_store %arg9[%c0_20, %c0_21], %26 {strides = array<i32>} : memref<32x128xf32, #tpu.memory_space<vmem>>, vector<32x128xf32>,
    return
  }
  func.func @transform_0(%arg0: i32) -> (i32, i32) {
    %c0_i32 = arith.constant 0 : i32
    %c0_i32_0 = arith.constant 0 : i32
    return %arg0, %c0_i32 : i32, i32
  }
  func.func @transform_1(%arg0: i32) -> (i32, i32) {
    %c0_i32 = arith.constant 0 : i32
    %c0_i32_0 = arith.constant 0 : i32
    return %arg0, %c0_i32 : i32, i32
  }
  func.func @transform_2(%arg0: i32) -> (i32, i32) {
    %c0_i32 = arith.constant 0 : i32
    %c0_i32_0 = arith.constant 0 : i32
    %c0_i32_1 = arith.constant 0 : i32
    return %c0_i32, %c0_i32_0 : i32, i32
  }
  func.func @transform_3(%arg0: i32) -> (i32, i32) {
    %c0_i32 = arith.constant 0 : i32
    %c0_i32_0 = arith.constant 0 : i32
    %c0_i32_1 = arith.constant 0 : i32
    return %c0_i32, %c0_i32_0 : i32, i32
  }
  func.func @transform_4(%arg0: i32) -> (i32, i32) {
    %c0_i32 = arith.constant 0 : i32
    %c0_i32_0 = arith.constant 0 : i32
    %c0_i32_1 = arith.constant 0 : i32
    return %c0_i32, %c0_i32_0 : i32, i32
  }
  func.func @transform_5(%arg0: i32) -> (i32, i32) {
    %c0_i32 = arith.constant 0 : i32
    %c0_i32_0 = arith.constant 0 : i32
    %c0_i32_1 = arith.constant 0 : i32
    return %c0_i32, %c0_i32_0 : i32, i32
  }
  func.func @transform_6(%arg0: i32) -> (i32, i32) {
    %c0_i32 = arith.constant 0 : i32
    %c0_i32_0 = arith.constant 0 : i32
    %c0_i32_1 = arith.constant 0 : i32
    return %c0_i32, %c0_i32_0 : i32, i32
  }
  func.func @transform_7(%arg0: i32) -> (i32, i32) {
    %c0_i32 = arith.constant 0 : i32
    %c0_i32_0 = arith.constant 0 : i32
    %c0_i32_1 = arith.constant 0 : i32
    return %c0_i32, %c0_i32_0 : i32, i32
  }
  func.func @transform_8(%arg0: i32) -> (i32, i32) {
    %c0_i32 = arith.constant 0 : i32
    %c0_i32_0 = arith.constant 0 : i32
    return %arg0, %c0_i32 : i32, i32
  }
}

module attributes {stable_mosaic.version = 11 : i64} {
  func.func @_sage_layer_kernel(%arg0: i32, %arg1: memref<32x32xbf16, #tpu.memory_space<vmem>>, %arg2: memref<32x32xbf16, #tpu.memory_space<vmem>>, %arg3: memref<32x16xbf16, #tpu.memory_space<vmem>>, %arg4: memref<32x16xbf16, #tpu.memory_space<vmem>>, %arg5: memref<32x64xbf16, #tpu.memory_space<vmem>>, %arg6: memref<1x64xf32, #tpu.memory_space<vmem>>, %arg7: memref<32x64xbf16, #tpu.memory_space<vmem>>, %arg8: memref<1x64xf32, #tpu.memory_space<vmem>>, %arg9: memref<32x128xbf16, #tpu.memory_space<vmem>>) attributes {dimension_semantics = [#tpu.dimension_semantics<parallel>], iteration_bounds = array<i64: 1>, scalar_prefetch = 0 : i64, scratch_operands = 0 : i64, tpu.core_type = #tpu.core_type<tc>, window_params = [{transform_indices = @transform_0, window_bounds = array<i64: 32, 32>}, {transform_indices = @transform_1, window_bounds = array<i64: 32, 32>}, {pipeline_mode = #tpu.pipeline_mode<synchronous>, transform_indices = @transform_2, window_bounds = array<i64: 32, 16>}, {pipeline_mode = #tpu.pipeline_mode<synchronous>, transform_indices = @transform_3, window_bounds = array<i64: 32, 16>}, {pipeline_mode = #tpu.pipeline_mode<synchronous>, transform_indices = @transform_4, window_bounds = array<i64: 32, 64>}, {pipeline_mode = #tpu.pipeline_mode<synchronous>, transform_indices = @transform_5, window_bounds = array<i64: 1, 64>}, {pipeline_mode = #tpu.pipeline_mode<synchronous>, transform_indices = @transform_6, window_bounds = array<i64: 32, 64>}, {pipeline_mode = #tpu.pipeline_mode<synchronous>, transform_indices = @transform_7, window_bounds = array<i64: 1, 64>}, {transform_indices = @transform_8, window_bounds = array<i64: 32, 128>}]} {
    %c32_i32 = arith.constant 32 : i32
    %0 = arith.muli %arg0, %c32_i32 : i32
    %1 = tpu.assume_multiple %0, 32 : i32
    %c0 = arith.constant 0 : index
    %c0_0 = arith.constant 0 : index
    %2 = vector.load %arg3[%c0, %c0_0] : memref<32x16xbf16, #tpu.memory_space<vmem>>, vector<32x16xbf16>
    %c0_1 = arith.constant 0 : index
    %c0_2 = arith.constant 0 : index
    %3 = vector.load %arg4[%c0_1, %c0_2] : memref<32x16xbf16, #tpu.memory_space<vmem>>, vector<32x16xbf16>
    %c0_3 = arith.constant 0 : index
    %c0_4 = arith.constant 0 : index
    %4 = vector.load %arg1[%c0_3, %c0_4] : memref<32x32xbf16, #tpu.memory_space<vmem>>, vector<32x32xbf16>
    %cst = arith.constant dense<0.000000e+00> : vector<32x16xf32>
    %5 = tpu.matmul %4, %2, %cst {dimension_numbers = #tpu.dot_dimension_numbers<[1], [0], [0], [1], [0, 0, 1, 1], [], []>} : vector<32x32xbf16>, vector<32x16xbf16>, vector<32x16xf32> -> vector<32x16xf32>
    %6 = arith.truncf %5 : vector<32x16xf32> to vector<32x16xbf16>
    %7 = arith.index_cast %1 : i32 to index
    %c0_5 = arith.constant 0 : index
    %8 = vector.load %arg3[%7, %c0_5] : memref<32x16xbf16, #tpu.memory_space<vmem>>, vector<32x16xbf16>
    %9 = tpu.concatenate %6, %8 in 1 : vector<32x16xbf16>, vector<32x16xbf16> -> vector<32x32xbf16>
    %c0_6 = arith.constant 0 : index
    %c0_7 = arith.constant 0 : index
    %10 = vector.load %arg5[%c0_6, %c0_7] : memref<32x64xbf16, #tpu.memory_space<vmem>>, vector<32x64xbf16>
    %cst_8 = arith.constant dense<0.000000e+00> : vector<32x64xf32>
    %11 = tpu.matmul %9, %10, %cst_8 {dimension_numbers = #tpu.dot_dimension_numbers<[1], [0], [0], [1], [0, 0, 1, 1], [], []>} : vector<32x32xbf16>, vector<32x64xbf16>, vector<32x64xf32> -> vector<32x64xf32>
    %c0_9 = arith.constant 0 : index
    %c0_10 = arith.constant 0 : index
    %12 = vector.load %arg6[%c0_9, %c0_10] : memref<1x64xf32, #tpu.memory_space<vmem>>, vector<1x64xf32>
    %13 = vector.broadcast %12 : vector<1x64xf32> to vector<32x64xf32>
    %14 = arith.addf %11, %13 : vector<32x64xf32>
    %c0_11 = arith.constant 0 : index
    %c0_12 = arith.constant 0 : index
    %15 = vector.load %arg2[%c0_11, %c0_12] : memref<32x32xbf16, #tpu.memory_space<vmem>>, vector<32x32xbf16>
    %cst_13 = arith.constant dense<0.000000e+00> : vector<32x16xf32>
    %16 = tpu.matmul %15, %3, %cst_13 {dimension_numbers = #tpu.dot_dimension_numbers<[1], [0], [0], [1], [0, 0, 1, 1], [], []>} : vector<32x32xbf16>, vector<32x16xbf16>, vector<32x16xf32> -> vector<32x16xf32>
    %17 = arith.truncf %16 : vector<32x16xf32> to vector<32x16xbf16>
    %18 = arith.index_cast %1 : i32 to index
    %c0_14 = arith.constant 0 : index
    %19 = vector.load %arg4[%18, %c0_14] : memref<32x16xbf16, #tpu.memory_space<vmem>>, vector<32x16xbf16>
    %20 = tpu.concatenate %17, %19 in 1 : vector<32x16xbf16>, vector<32x16xbf16> -> vector<32x32xbf16>
    %c0_15 = arith.constant 0 : index
    %c0_16 = arith.constant 0 : index
    %21 = vector.load %arg7[%c0_15, %c0_16] : memref<32x64xbf16, #tpu.memory_space<vmem>>, vector<32x64xbf16>
    %cst_17 = arith.constant dense<0.000000e+00> : vector<32x64xf32>
    %22 = tpu.matmul %20, %21, %cst_17 {dimension_numbers = #tpu.dot_dimension_numbers<[1], [0], [0], [1], [0, 0, 1, 1], [], []>} : vector<32x32xbf16>, vector<32x64xbf16>, vector<32x64xf32> -> vector<32x64xf32>
    %c0_18 = arith.constant 0 : index
    %c0_19 = arith.constant 0 : index
    %23 = vector.load %arg8[%c0_18, %c0_19] : memref<1x64xf32, #tpu.memory_space<vmem>>, vector<1x64xf32>
    %24 = vector.broadcast %23 : vector<1x64xf32> to vector<32x64xf32>
    %25 = arith.addf %22, %24 : vector<32x64xf32>
    %cst_20 = arith.constant 0.000000e+00 : f32
    %26 = vector.broadcast %cst_20 : f32 to vector<32x64xf32>
    %27 = arith.maximumf %14, %26 : vector<32x64xf32>
    %cst_21 = arith.constant 0.000000e+00 : f32
    %28 = vector.broadcast %cst_21 : f32 to vector<32x64xf32>
    %29 = arith.maximumf %25, %28 : vector<32x64xf32>
    %30 = tpu.concatenate %27, %29 in 1 : vector<32x64xf32>, vector<32x64xf32> -> vector<32x128xf32>
    %31 = arith.truncf %30 : vector<32x128xf32> to vector<32x128xbf16>
    %c0_22 = arith.constant 0 : index
    %c0_23 = arith.constant 0 : index
    %32 = vector.load %arg9[%c0_22, %c0_23] : memref<32x128xbf16, #tpu.memory_space<vmem>>, vector<32x128xbf16>
    tpu.vector_store %arg9[%c0_22, %c0_23], %31 {strides = array<i32>} : memref<32x128xbf16, #tpu.memory_space<vmem>>, vector<32x128xbf16>,
    return
  }
  func.func @transform_0(%arg0: i32) -> (i32, i32) {
    %c0_i32 = arith.constant 0 : i32
    %c0_i32_0 = arith.constant 0 : i32
    return %arg0, %c0_i32 : i32, i32
  }
  func.func @transform_1(%arg0: i32) -> (i32, i32) {
    %c0_i32 = arith.constant 0 : i32
    %c0_i32_0 = arith.constant 0 : i32
    return %arg0, %c0_i32 : i32, i32
  }
  func.func @transform_2(%arg0: i32) -> (i32, i32) {
    %c0_i32 = arith.constant 0 : i32
    %c0_i32_0 = arith.constant 0 : i32
    %c0_i32_1 = arith.constant 0 : i32
    return %c0_i32, %c0_i32_0 : i32, i32
  }
  func.func @transform_3(%arg0: i32) -> (i32, i32) {
    %c0_i32 = arith.constant 0 : i32
    %c0_i32_0 = arith.constant 0 : i32
    %c0_i32_1 = arith.constant 0 : i32
    return %c0_i32, %c0_i32_0 : i32, i32
  }
  func.func @transform_4(%arg0: i32) -> (i32, i32) {
    %c0_i32 = arith.constant 0 : i32
    %c0_i32_0 = arith.constant 0 : i32
    %c0_i32_1 = arith.constant 0 : i32
    return %c0_i32, %c0_i32_0 : i32, i32
  }
  func.func @transform_5(%arg0: i32) -> (i32, i32) {
    %c0_i32 = arith.constant 0 : i32
    %c0_i32_0 = arith.constant 0 : i32
    %c0_i32_1 = arith.constant 0 : i32
    return %c0_i32, %c0_i32_0 : i32, i32
  }
  func.func @transform_6(%arg0: i32) -> (i32, i32) {
    %c0_i32 = arith.constant 0 : i32
    %c0_i32_0 = arith.constant 0 : i32
    %c0_i32_1 = arith.constant 0 : i32
    return %c0_i32, %c0_i32_0 : i32, i32
  }
  func.func @transform_7(%arg0: i32) -> (i32, i32) {
    %c0_i32 = arith.constant 0 : i32
    %c0_i32_0 = arith.constant 0 : i32
    %c0_i32_1 = arith.constant 0 : i32
    return %c0_i32, %c0_i32_0 : i32, i32
  }
  func.func @transform_8(%arg0: i32) -> (i32, i32) {
    %c0_i32 = arith.constant 0 : i32
    %c0_i32_0 = arith.constant 0 : i32
    return %arg0, %c0_i32 : i32, i32
  }
}

</mosaic_0001>

<bundles_post_ra>
// kernel: directed_gnn_forward.3
= control target key start
LH: loop header
LB: loop body
LE: loop exit
PB: predicated region body
PF: predicated region fallthrough
CT: control target
= control target key end

     0   :  { %vm65_vm0 = vcmask 261120   ;;  %s589_s17 = smov 32   ;;  %vm190_vm1 = vcmask 523264   ;;  %s590_s20 = smov 64   ;;  %s730_s3 = inlined_call_operand.vmem [shape: bf16[32,32], index: 3, kind: input, shape index: {}]   ;;  %s731_s1 = inlined_call_operand.vmem [shape: bf16[32,32], index: 1, kind: input, shape index: {}]   ;;  %s732_s2 = inlined_call_operand.vmem [shape: bf16[32,32], index: 2, kind: input, shape index: {}]   ;;  %s733_s0 = inlined_call_operand.vmem [shape: bf16[32,32], index: 0, kind: input, shape index: {}]   ;;  %s734_s6 = inlined_call_operand.vmem [shape: bf16[64,64], index: 6, kind: input, shape index: {}]   ;;  %s735_s4 = inlined_call_operand.vmem [shape: bf16[64,64], index: 4, kind: input, shape index: {}]   ;;  %s736_s7 = inlined_call_operand.vmem [shape: f32[1,64], index: 7, kind: input, shape index: {}]   ;;  %s737_s5 = inlined_call_operand.vmem [shape: f32[1,64], index: 5, kind: input, shape index: {}]   ;;  %s738_s8 = inlined_call_operand.vmem [shape: f32[32,128], index: 8, kind: output, shape index: {}]  }
   0x1   :  { %v569_v0 = vld [vmem:[%s730_s3] sm:$0xff]   ;;  %v570_v1 = vld [vmem:[%s730_s3 + $0x8] sm:$0xff]   ;;  %v582_v13 = vld [vmem:[%s734_s6 + $0x10] sm:$0xff]  }
   0x2   :  { %547 = vmatprep.subr.bf16.mxu0 %v569_v0  ;;  %v571_v2 = vld [vmem:[%s731_s1] sm:$0xff]   ;;  %v572_v3 = vld [vmem:[%s731_s1 + $0x8] sm:$0xff]   ;;  %v584_v15 = vld [vmem:[%s734_s6 + $0x18] sm:$0xff]  }
   0x3   :  { %548 = vmatpush3.bf16.msra.mxu0 %v569_v0  ;;  %551 = vmatprep.mubr.msk.bf16.mxu0 %vm65_vm0, %v571_v2  ;;  %v573_v4 = vld [vmem:[%s730_s3] sm:$0xff]   ;;  %v574_v5 = vld [vmem:[%s730_s3 + $0x8] sm:$0xff]   ;;  %v587_v18 = vld [vmem:[%s735_s4 + $0x10] sm:$0xff]  }
   0x4   :  { %549 = vmatprep.subr.bf16.mxu0 %v570_v1  ;;  %343 = vrot.lane.b32.xlu0 %v573_v4, %s589_s17  ;;  %v575_v6 = vld [vmem:[%s732_s2] sm:$0xff]   ;;  %v576_v7 = vld [vmem:[%s732_s2 + $0x8] sm:$0xff]   ;;  %v588_v19 = vld [vmem:[%s735_s4 + $0x18] sm:$0xff]  }
   0x5   :  { %527 = vmatprep.subr.bf16.mxu1 %v575_v6  ;;  %v577_v8 = vld [vmem:[%s733_s0] sm:$0xff]   ;;  %v578_v9 = vld [vmem:[%s733_s0 + $0x8] sm:$0xff]  }
   0x6   :  { %528 = vmatpush3.bf16.msra.mxu1 %v575_v6  ;;  %v579_v10 = vld [vmem:[%s734_s6] sm:$0xff]   ;;  %531 = vmatprep.mubr.msk.bf16.mxu1 %vm65_vm0, %v577_v8  ;;  %v580_v11 = vld [vmem:[%s734_s6 + $0x8] sm:$0xff]  }
   0x7   :  { %550 = vmatpush3.bf16.msra.mxu0 %v570_v1  ;;  %529 = vmatprep.subr.bf16.mxu1 %v576_v7  ;;  %v581_v12 = vld [vmem:[%s732_s2] sm:$0xff]   ;;  %v583_v14 = vld [vmem:[%s732_s2 + $0x8] sm:$0xff]  }
   0x8   :  { %345 = vrot.lane.b32.xlu0 %v574_v5, %s589_s17  ;;  %555 = vmatprep.subr.bf16.mxu0 %v579_v10  ;;  %v585_v16 = vld [vmem:[%s735_s4] sm:$0xff]   ;;  %v586_v17 = vld [vmem:[%s735_s4 + $0x8] sm:$0xff]  }
   0x9   :  { %141 = vrot.lane.b32.xlu1 %v581_v12, %s589_s17  ;;  %v500_v40 = vld [vmem:[%s736_s7] ss:$0 sm:$0xff] }
   0xa   :  { %552 = vmatmul.mubr.msk.bf16.vlgmr.msra.gmra.mrb[0].mxu0 %vm65_vm0, %v572_v3  ;;  %530 = vmatpush3.bf16.msra.mxu1 %v576_v7  ;;  %v485_v53 = vld [vmem:[%s737_s5] ss:$0 sm:$0xff] }
   0xb   :  { %556 = vmatpush3.bf16.msra.mxu0 %v579_v10  ;;  %535 = vmatprep.subr.bf16.mxu1 %v585_v16 }
   0xc   :  { %557 = vmatprep.subr.bf16.mxu0 %v580_v11 }
   0xd   :  { %532 = vmatmul.mubr.msk.bf16.vlgmr.msra.gmra.mrb[0].mxu1 %vm65_vm0, %v578_v9  ;;  %143 = vrot.lane.b32.xlu1 %v583_v14, %s589_s17 }
   0xe   :  { %536 = vmatpush3.bf16.msra.mxu1 %v585_v16 }
   0xf   :  { %558 = vmatpush3.bf16.msra.mxu0 %v580_v11  ;;  %537 = vmatprep.subr.bf16.mxu1 %v586_v17 }
  0x10   :  { %559 = vmatprep.subr.bf16.mxu0 %v582_v13 }
  0x12   :  { %538 = vmatpush3.bf16.msra.mxu1 %v586_v17 }
  0x13   :  { %560 = vmatpush3.bf16.msra.mxu0 %v582_v13  ;;  %539 = vmatprep.subr.bf16.mxu1 %v587_v18 }
  0x14   :  { %561 = vmatprep.subr.bf16.mxu0 %v584_v15 }
  0x16   :  { %540 = vmatpush3.bf16.msra.mxu1 %v587_v18 }
  0x17   :  { %562 = vmatpush3.bf16.msra.mxu0 %v584_v15  ;;  %541 = vmatprep.subr.bf16.mxu1 %v588_v19 }
  0x1a   :  { %542 = vmatpush3.bf16.msra.mxu1 %v588_v19 }
  0x76   :  { %v344_v20 = vpop.permute.xlu0 %343 }
  0x7a   :  { %v346_v28 = vpop.permute.xlu0 %345 }
  0x7b   :  { %v142_v24 = vpop.permute.xlu1 %141 }
  0x7f   :  { %v144_v34 = vpop.permute.xlu1 %143 }
  0xdd   :  { %v553_v21 = vpop.f32.mrb[0].mxu0 }
  0xde   :  { %v310_v22 = vpop.f32.mrb[1].mxu0 }
  0xdf   :  { %v554_v23 = vpop.f32.mrb[2].mxu0 }
  0xe0   :  { %v326_v25 = vpack.c.bf16 %v554_v23, %v553_v21  ;;  %v313_v26 = vpop.f32.mrb[3].mxu0  ;;  %v533_v30 = vpop.f32.mrb[0].mxu1 }
  0xe1   :  { %v325_v27 = vpack.c.bf16 %v313_v26, %v310_v22  ;;  %v106_v32 = vpop.f32.mrb[1].mxu1 }
  0xe2   :  { %v352_v31 = vsel %vm65_vm0, %v326_v25, %v346_v28  ;;  %v534_v33 = vpop.f32.mrb[2].mxu1 }
  0xe3   :  { %v349_v29 = vsel %vm65_vm0, %v325_v27, %v344_v20  ;;  %v122_v35 = vpack.c.bf16 %v534_v33, %v533_v30  ;;  %v109_v36 = vpop.f32.mrb[3].mxu1 }
  0xe4   :  { %563 = vmatprep.mubr.msk.bf16.mxu0 %vm190_vm1, %v349_v29  ;;  %v121_v37 = vpack.c.bf16 %v109_v36, %v106_v32 }
  0xe5   :  { %564 = vmatmul.mubr.msk.bf16.vlgmr.msra.gmra.mrb[4].mxu0 %vm190_vm1, %v352_v31  ;;  %v150_v38 = vsel %vm65_vm0, %v122_v35, %v144_v34 }
  0xe6   :  { %v147_v39 = vsel %vm65_vm0, %v121_v37, %v142_v24 }
  0xe7   :  { %543 = vmatprep.mubr.msk.bf16.mxu1 %vm190_vm1, %v147_v39 }
  0xe8   :  { %544 = vmatmul.mubr.msk.bf16.vlgmr.msra.gmra.mrb[4].mxu1 %vm190_vm1, %v150_v38 }
 0x1b8   :  { %v565_v41 = vpop.f32.mrb[4].mxu0 }
 0x1b9   :  { %v430_v42 = vpop.f32.mrb[5].mxu0  ;;  %v439_v47 = vadd.f32 %v565_v41, %v500_v40 }
 0x1ba   :  { %v431_v43 = vadd.f32 %v500_v40, %v430_v42  ;;  %v566_v44 = vpop.f32.mrb[6].mxu0 }
 0x1bb   :  { %v433_v45 = vpop.f32.mrb[7].mxu0  ;;  %v545_v48 = vpop.f32.mrb[4].mxu1  ;;  %v442_v50 = vadd.f32 %v566_v44, %v500_v40 }
 0x1bc   :  { %v434_v46 = vadd.f32 %v500_v40, %v433_v45  ;;  %449 = vrot.lane.b32.xlu0 %v431_v43, %s590_s20  ;;  %v229_v49 = vpop.f32.mrb[5].mxu1  ;;  %v238_v59 = vadd.f32 %v545_v48, %v485_v53 }
 0x1bd   :  { %v546_v51 = vpop.f32.mrb[6].mxu1  ;;  %v230_v54 = vadd.f32 %v485_v53, %v229_v49 }
 0x1be   :  { %451 = vrot.lane.b32.xlu1 %v434_v46, %s590_s20  ;;  %v232_v52 = vpop.f32.mrb[7].mxu1  ;;  %v241_v62 = vadd.f32 %v546_v51, %v485_v53 }
 0x1bf   :  { %v233_v56 = vadd.f32 %v485_v53, %v232_v52 }
 0x1c0   :  { %453 = vrot.lane.b32.xlu0 %v439_v47, %s590_s20 }
 0x1c2   :  { %455 = vrot.lane.b32.xlu1 %v442_v50, %s590_s20 }
 0x22e   :  { %v450_v55 = vpop.permute.xlu0 %449 }
 0x22f   :  { %v461_v57 = vsel %vm190_vm1, %v230_v54, %v450_v55 }
 0x230   :  { %465 = vst [vmem:[%s738_s8] sm:$0xff] %v461_v57  ;;  %v452_v58 = vpop.permute.xlu1 %451 }
 0x231   :  { %v462_v60 = vsel %vm190_vm1, %v233_v56, %v452_v58 }
 0x232   :  { %466 = vst [vmem:[%s738_s8 + $0x8] sm:$0xff] %v462_v60  ;;  %v454_v61 = vpop.permute.xlu0 %453 }
 0x233   :  { %v463_v63 = vsel %vm190_vm1, %v238_v59, %v454_v61 }
 0x234   :  { %467 = vst [vmem:[%s738_s8 + $0x10] sm:$0xff] %v463_v63  ;;  %v456_v0 = vpop.permute.xlu1 %455 }
 0x235   :  { %v464_v1 = vsel %vm190_vm1, %v241_v62, %v456_v0 }
 0x236   :  { %468 = vst [vmem:[%s738_s8 + $0x18] sm:$0xff] %v464_v1 }

// kernel: directed_gnn_forward.2
= control target key start
LH: loop header
LB: loop body
LE: loop exit
PB: predicated region body
PF: predicated region fallthrough
CT: control target
= control target key end

     0   :  { %vm65_vm0 = vcmask 261120   ;;  %vm145_vm1 = vcmask 130048   ;;  %s592_s12 = smov 64   ;;  %vm437_vm2 = vcmask 523264   ;;  %s714_s2 = inlined_call_operand.vmem [shape: bf16[32,16], index: 2, kind: input, shape index: {}]   ;;  %s715_s0 = inlined_call_operand.vmem [shape: bf16[32,32], index: 0, kind: input, shape index: {}]   ;;  %s716_s3 = inlined_call_operand.vmem [shape: bf16[32,16], index: 3, kind: input, shape index: {}]   ;;  %s717_s1 = inlined_call_operand.vmem [shape: bf16[32,32], index: 1, kind: input, shape index: {}]   ;;  %s718_s4 = inlined_call_operand.vmem [shape: bf16[32,64], index: 4, kind: input, shape index: {}]   ;;  %s719_s6 = inlined_call_operand.vmem [shape: bf16[32,64], index: 6, kind: input, shape index: {}]   ;;  %s720_s7 = inlined_call_operand.vmem [shape: f32[1,64], index: 7, kind: input, shape index: {}]   ;;  %s721_s5 = inlined_call_operand.vmem [shape: f32[1,64], index: 5, kind: input, shape index: {}]   ;;  %s722_s8 = inlined_call_operand.vmem [shape: bf16[32,128], index: 8, kind: output, shape index: {}]  }
   0x1   :  { %v575_v0 = vld [vmem:[%s714_s2] sm:$0xff]   ;;  %v576_v1 = vld [vmem:[%s714_s2 + $0x8] sm:$0xff]  }
   0x2   :  { %531 = vmatprep.subr.bf16.mxu0 %v575_v0  ;;  %v577_v2 = vld [vmem:[%s715_s0] sm:$0xff]   ;;  %v578_v4 = vld [vmem:[%s715_s0 + $0x8] sm:$0xff]   ;;  %s591_s0 = smov 16  }
   0x3   :  { %532 = vmatpush3.bf16.msra.mxu0 %v575_v0  ;;  %535 = vmatprep.mubr.msk.bf16.mxu0 %vm65_vm0, %v577_v2  ;;  %v579_v3 = vld [vmem:[%s716_s3] sm:$0xff]   ;;  %v580_v5 = vld [vmem:[%s716_s3 + $0x8] sm:$0xff]  }
   0x4   :  { %533 = vmatprep.subr.bf16.mxu0 %v576_v1  ;;  %v581_v6 = vld [vmem:[%s717_s1] sm:$0xff]   ;;  %v584_v8 = vld [vmem:[%s714_s2 + $0x8] sm:$0xff]  }
   0x5   :  { %v583_v7 = vld [vmem:[%s714_s2] sm:$0xff]   ;;  %v586_v10 = vld [vmem:[%s716_s3 + $0x8] sm:$0xff]  }
   0x6   :  { %141 = vrot.lane.b32.xlu0 %v583_v7, %s591_s0  ;;  %v585_v9 = vld [vmem:[%s716_s3] sm:$0xff]   ;;  %v582_v12 = vld [vmem:[%s717_s1 + $0x8] sm:$0xff]  }
   0x7   :  { %534 = vmatpush3.bf16.msra.mxu0 %v576_v1  ;;  %327 = vrot.lane.b32.xlu1 %v585_v9, %s591_s0  ;;  %v587_v11 = vld [vmem:[%s718_s4] sm:$0xff]   ;;  %v588_v13 = vld [vmem:[%s718_s4 + $0x8] sm:$0xff]  }
   0x8   :  { %547 = vmatprep.subr.bf16.mxu0 %v579_v3  ;;  %539 = vmatprep.subr.bf16.mxu1 %v587_v11  ;;  %v589_v14 = vld [vmem:[%s719_s6] sm:$0xff]   ;;  %v590_v25 = vld [vmem:[%s719_s6 + $0x8] sm:$0xff]  }
   0x9   :  { %540 = vmatpush3.bf16.msra.mxu1 %v587_v11  ;;  %v491_v40 = vld [vmem:[%s720_s7] ss:$0 sm:$0xff] }
   0xa   :  { %536 = vmatmul.mubr.msk.bf16.vlgmr.msra.gmra.mrb[0].mxu0 %vm65_vm0, %v578_v4  ;;  %143 = vrot.lane.b32.xlu0 %v584_v8, %s591_s0  ;;  %v478_v55 = vld [vmem:[%s721_s5] ss:$0 sm:$0xff] }
   0xb   :  { %548 = vmatpush3.bf16.msra.mxu0 %v579_v3  ;;  %551 = vmatprep.mubr.msk.bf16.mxu0 %vm65_vm0, %v581_v6 }
   0xc   :  { %549 = vmatprep.subr.bf16.mxu0 %v580_v5  ;;  %329 = vrot.lane.b32.xlu1 %v586_v10, %s591_s0 }
   0xd   :  { %541 = vmatprep.subr.bf16.mxu1 %v588_v13 }
   0xe   :  { %542 = vmatpush3.bf16.msra.mxu1 %v588_v13 }
   0xf   :  { %550 = vmatpush3.bf16.msra.mxu0 %v580_v5  ;;  %555 = vmatprep.subr.bf16.mxu1 %v589_v14 }
  0x12   :  { %552 = vmatmul.mubr.msk.bf16.vlgmr.msra.gmra.mrb[4].mxu0 %vm65_vm0, %v582_v12 }
  0x78   :  { %v142_v15 = vpop.permute.xlu0 %141 }
  0x79   :  { %v328_v24 = vpop.permute.xlu1 %327 }
  0x7c   :  { %v144_v22 = vpop.permute.xlu0 %143 }
  0x7e   :  { %v330_v33 = vpop.permute.xlu1 %329 }
  0xdd   :  { %v537_v16 = vpop.f32.mrb[0].mxu0 }
  0xde   :  { %v106_v17 = vpop.f32.mrb[1].mxu0 }
  0xdf   :  { %v538_v18 = vpop.f32.mrb[2].mxu0 }
  0xe0   :  { %v122_v19 = vpack.c.bf16 %v538_v18, %v537_v16  ;;  %v109_v20 = vpop.f32.mrb[3].mxu0 }
  0xe1   :  { %v121_v21 = vpack.c.bf16 %v109_v20, %v106_v17 }
  0xe2   :  { %v151_v26 = vsel %vm145_vm1, %v122_v19, %v144_v22 }
  0xe3   :  { %v148_v23 = vsel %vm145_vm1, %v121_v21, %v142_v15 }
  0xe4   :  { %543 = vmatprep.mubr.msk.bf16.mxu1 %vm65_vm0, %v148_v23 }
  0xe5   :  { %544 = vmatmul.mubr.msk.bf16.vlgmr.msra.gmra.mrb[0].mxu1 %vm65_vm0, %v151_v26  ;;  %v553_v27 = vpop.f32.mrb[4].mxu0 }
  0xe6   :  { %v294_v28 = vpop.f32.mrb[5].mxu0  ;;  %556 = vmatpush3.bf16.msra.mxu1 %v589_v14 }
  0xe7   :  { %v554_v29 = vpop.f32.mrb[6].mxu0  ;;  %557 = vmatprep.subr.bf16.mxu1 %v590_v25 }
  0xe8   :  { %v310_v30 = vpack.c.bf16 %v554_v29, %v553_v27  ;;  %v297_v31 = vpop.f32.mrb[7].mxu0 }
  0xe9   :  { %v309_v32 = vpack.c.bf16 %v297_v31, %v294_v28 }
  0xea   :  { %558 = vmatpush3.bf16.msra.mxu1 %v590_v25  ;;  %v336_v35 = vsel %vm145_vm1, %v310_v30, %v330_v33 }
  0xeb   :  { %v333_v34 = vsel %vm145_vm1, %v309_v32, %v328_v24 }
  0xec   :  { %559 = vmatprep.mubr.msk.bf16.mxu1 %vm65_vm0, %v333_v34 }
  0xed   :  { %560 = vmatmul.mubr.msk.bf16.vlgmr.msra.gmra.mrb[4].mxu1 %vm65_vm0, %v336_v35 }
 0x1b8   :  { %v545_v36 = vpop.f32.mrb[0].mxu1 }
 0x1b9   :  { %v213_v37 = vpop.f32.mrb[1].mxu1  ;;  %v222_v56 = vadd.f32 %v545_v36, %v478_v55 }
 0x1ba   :  { %v546_v38 = vpop.f32.mrb[2].mxu1  ;;  %v214_v58 = vadd.f32 %v478_v55, %v213_v37 }
 0x1bb   :  { %v216_v39 = vpop.f32.mrb[3].mxu1  ;;  %v225_v57 = vadd.f32 %v546_v38, %v478_v55  ;;  %v415_v61 = vmax.f32 %v222_v56, 0.0 }
 0x1bc   :  { %v217_v59 = vadd.f32 %v478_v55, %v216_v39  ;;  %v413_v2 = vmax.f32 %v214_v58, 0.0 }
 0x1bd   :  { %v416_v62 = vmax.f32 %v225_v57, 0.0 }
 0x1be   :  { %v414_v3 = vmax.f32 %v217_v59, 0.0 }
 0x1c0   :  { %v561_v41 = vpop.f32.mrb[4].mxu1 }
 0x1c1   :  { %v407_v42 = vadd.f32 %v561_v41, %v491_v40  ;;  %v398_v43 = vpop.f32.mrb[5].mxu1 }
 0x1c2   :  { %v399_v44 = vadd.f32 %v491_v40, %v398_v43  ;;  %v562_v45 = vpop.f32.mrb[6].mxu1 }
 0x1c3   :  { %v410_v46 = vadd.f32 %v562_v45, %v491_v40  ;;  %v401_v47 = vpop.f32.mrb[7].mxu1  ;;  %v419_v49 = vmax.f32 %v407_v42, 0.0 }
 0x1c4   :  { %v402_v48 = vadd.f32 %v491_v40, %v401_v47  ;;  %v417_v51 = vmax.f32 %v399_v44, 0.0 }
 0x1c5   :  { %v420_v50 = vmax.f32 %v410_v46, 0.0 }
 0x1c6   :  { %v418_v52 = vmax.f32 %v402_v48, 0.0 }
 0x1c7   :  { %v570_v53 = vpack.i.bf16 %v420_v50, %v419_v49 }
 0x1c8   :  { %v565_v54 = vpack.i.bf16 %v418_v52, %v417_v51 }
 0x1c9   :  { %571 = vrot.lane.b32.xlu1 %v570_v53, %s592_s12 }
 0x1ca   :  { %566 = vrot.lane.b32.xlu0 %v565_v54, %s592_s12 }
 0x23b   :  { %v572_v60 = vpop.permute.xlu1 %571 }
 0x23c   :  { %v574_v63 = vunpack.i.h.bf16 %v572_v60  ;;  %v573_v0 = vunpack.i.l.bf16 %v572_v60  ;;  %v567_v1 = vpop.permute.xlu0 %566 }
 0x23d   :  { %v569_v4 = vunpack.i.h.bf16 %v567_v1  ;;  %v568_v5 = vunpack.i.l.bf16 %v567_v1 }
 0x23e   :  { %v441_v6 = vsel %vm437_vm2, %v416_v62, %v574_v63  ;;  %v440_v7 = vsel %vm437_vm2, %v415_v61, %v573_v0 }
 0x23f   :  { %v512_v8 = vpack.c.bf16 %v441_v6, %v440_v7  ;;  %v438_v9 = vsel %vm437_vm2, %v413_v2, %v568_v5  ;;  %v439_v10 = vsel %vm437_vm2, %v414_v3, %v569_v4 }
 0x240   :  { %v507_v11 = vpack.c.bf16 %v439_v10, %v438_v9 }
 0x241   :  { %514 = vst [vmem:[%s722_s8 + $0x8] sm:$0xff] %v512_v8  }
 0x242   :  { %508 = vst [vmem:[%s722_s8] sm:$0xff] %v507_v11  }

</bundles_post_ra>
